<compile_context>
chip_gen: v5e
topology: v5e:2x2
jax: 0.10.0
libtpu: 0.0.40
codegen_flags: <defaults>
</compile_context>

<pallas_src>
import jax
import jax.numpy as jnp
from jax.experimental import pallas as pl
from jax.experimental.pallas import tpu as pltpu


def ode_euler_kernel(x_ref, w_ref, b_ref, o_ref, s_ref):
    # x_ref : (Gb, H, PWC)      Gb lane-packed groups (P images per group)
    # w_ref : (3*PWC, PWC)      block-diagonal banded conv weights (all 9 taps)
    # b_ref : (1, PWC)          bias replicated over (P, W)
    # o_ref : (Gb, H, PWC)      output tile
    # s_ref : (Gb*H, 3*PWC)     VMEM scratch: im2row patches (3 row shifts)
    Gb, H, PWC = x_ref.shape

    # Build the im2row scratch.  Three row-shifted copies of each lane-packed
    # image at lane offsets 0 / PWC / 2*PWC (all 128-aligned).  Every element
    # (incl. the top/bottom zero-boundary rows) is written every step, so no
    # zero-fill / pl.when init is needed and the kernel stays correct under any
    # core-parallel partitioning of the grid.
    zrow = jnp.zeros((1, PWC), dtype=s_ref.dtype)
    for g in range(Gb):                      # small static loop, unrolled
        xg = x_ref[g]                        # (H, PWC) float32
        r0 = g * H
        # ky = 0  (input row h-1)
        s_ref[r0:r0 + 1, 0:PWC] = zrow
        s_ref[r0 + 1:r0 + H, 0:PWC] = xg[0:H - 1, :]
        # ky = 1  (input row h)
        s_ref[r0:r0 + H, PWC:2 * PWC] = xg
        # ky = 2  (input row h+1)
        s_ref[r0:r0 + H - 1, 2 * PWC:3 * PWC] = xg[1:H, :]
        s_ref[r0 + H - 1:r0 + H, 2 * PWC:3 * PWC] = zrow

    # One fused MXU matmul over all 9 taps and all Gb*P images in the block:
    # (Gb*H, 3*PWC) @ (3*PWC, PWC) -> (Gb*H, PWC)
    conv = jnp.dot(s_ref[...], w_ref[...], preferred_element_type=jnp.float32)

    f = jnp.tanh(conv + b_ref[...])          # f(0, x); bias broadcasts over rows

    # Euler step over ts = [0.0, 1.0]:  y1 = y0 + (t1 - t0) * f(t0, y0), dt = 1
    x_flat = x_ref[...].reshape(Gb * H, PWC)
    o_ref[...] = (x_flat + f).reshape(Gb, H, PWC).astype(o_ref.dtype)


def ode_block_forward(x_nchw, w, b):
    """x_nchw: (N, C, H, W) float32; w: (3, 3, C, C) HWIO; b: (C,)."""
    N, C, H, W = x_nchw.shape
    WC = W * C

    # Lane-packing factor: pack P images side-by-side so the lane axis is 128.
    P = 128 // WC if (WC < 128 and 128 % WC == 0) else 1
    PWC = P * WC

    # NCHW -> NHWC -> (N, H, W*C), pad batch to a multiple of P with zero images.
    x_nhwc = jnp.transpose(x_nchw, (0, 2, 3, 1)).reshape(N, H, WC)
    Np = ((N + P - 1) // P) * P
    if Np != N:
        pad = jnp.zeros((Np - N, H, WC), dtype=x_nhwc.dtype)
        x_nhwc = jnp.concatenate([x_nhwc, pad], axis=0)
    G = Np // P
    # (Np,H,WC) -> (G,P,H,WC) -> (G,H,P,WC) -> (G,H,P*WC)
    x_grp = x_nhwc.reshape(G, P, H, WC).transpose(0, 2, 1, 3).reshape(G, H, PWC)

    # Banded per-image weights with W-padding folded away (K = 3*W*C):
    #   w_big5[ky, wi, ci, wo, co] = w[ky, wi-wo+1, ci, co] if 0<=wi-wo+1<3 else 0
    sel = jnp.stack([jnp.eye(W, W, k=1 - kx, dtype=w.dtype) for kx in range(3)])
    w_big5 = jnp.einsum("abio,bjq->ajiqo", w, sel)          # (3, W, C, W, C)
    # Block-diagonal over the P lane-packed images -> (3*P*W*C, P*W*C).
    eye_p = jnp.eye(P, dtype=w.dtype)
    w_blk = jnp.einsum("ajiqo,pr->apjirqo", w_big5, eye_p).reshape(3 * PWC, PWC)

    # Bias replicated over (P, W) along the lane axis.
    b_row = jnp.tile(b, P * W).reshape(1, PWC)

    # Group-blocks per grid step: largest divisor of G with Gb*H <= 256 rows.
    Gb = 1
    for d in range(1, G + 1):
        if G % d == 0 and d * H <= 256:
            Gb = d

    out_grp = pl.pallas_call(
        ode_euler_kernel,
        out_shape=jax.ShapeDtypeStruct((G, H, PWC), x_grp.dtype),
        grid_spec=pltpu.PrefetchScalarGridSpec(
            num_scalar_prefetch=0,
            grid=(G // Gb,),
            in_specs=[
                pl.BlockSpec((Gb, H, PWC), lambda g: (g, 0, 0)),
                pl.BlockSpec((3 * PWC, PWC), lambda g: (0, 0)),
                pl.BlockSpec((1, PWC), lambda g: (0, 0)),
            ],
            out_specs=pl.BlockSpec((Gb, H, PWC), lambda g: (g, 0, 0)),
            scratch_shapes=[pltpu.VMEM((Gb * H, 3 * PWC), jnp.float32)],
        ),
        compiler_params=pltpu.CompilerParams(
            # Group axis is independent; on v7x this could be
            # pltpu.CORE_PARALLEL to shard across both TensorCores.
            dimension_semantics=(pltpu.PARALLEL,),
            vmem_limit_bytes=32 * 1024 * 1024,
        ),
    )(x_grp, w_blk, b_row)

    # Unpack lanes: (G,H,PWC) -> (G,H,P,WC) -> (G,P,H,WC) -> (Np,H,W,C) -> [:N]
    out = out_grp.reshape(G, H, P, WC).transpose(0, 2, 1, 3)
    out = out.reshape(Np, H, W, C)[:N]
    return jnp.transpose(out, (0, 3, 1, 2))  # NHWC -> NCHW


def _reference(x_nchw, w, b):
    """Pure-JAX reference: x + tanh(conv3x3_same(x) + b)  (one Euler step)."""
    x = jnp.transpose(x_nchw, (0, 2, 3, 1))  # NHWC
    conv = jax.lax.conv_general_dilated(
        x, w, window_strides=(1, 1), padding="SAME",
        dimension_numbers=("NHWC", "HWIO", "NHWC"))
    y = x + jnp.tanh(conv + b)
    return jnp.transpose(y, (0, 3, 1, 2))


if __name__ == "__main__":
    key = jax.random.PRNGKey(0)
    kx, kw, kb = jax.random.split(key, 3)

    N, C, H, W = 2, 4, 16, 16
    x = jax.random.normal(kx, (N, C, H, W), dtype=jnp.float32)

    # Deterministic synthetic parameters for the differential function
    # (3x3 conv, C -> C, HWIO layout), scaled like a torch default init.
    # TODO(synk): torchdiffeq's adjoint / tolerance machinery has no effect on
    # the forward pass with method='euler' and ts=[0,1]; it is not reproduced.
    fan_in = C * 3 * 3
    bound = 1.0 / jnp.sqrt(fan_in)
    w = jax.random.uniform(kw, (3, 3, C, C), minval=-bound, maxval=bound,
                           dtype=jnp.float32)
    b = jax.random.uniform(kb, (C,), minval=-bound, maxval=bound,
                           dtype=jnp.float32)

    out = jax.block_until_ready(ode_block_forward(x, w, b))
    ref = jax.block_until_ready(_reference(x, w, b))

    assert out.shape == (N, C, H, W)
    assert jnp.allclose(out, ref, atol=1e-5, rtol=1e-5)
    print("KERNEL_OK")
</pallas_src>

<mosaic_0001>
module attributes {stable_mosaic.version = 11 : i64} {
  func.func @ode_euler_kernel(%arg0: i32, %arg1: memref<1x16x128xf32, #tpu.memory_space<vmem>>, %arg2: memref<384x128xf32, #tpu.memory_space<vmem>>, %arg3: memref<1x128xf32, #tpu.memory_space<vmem>>, %arg4: memref<1x16x128xf32, #tpu.memory_space<vmem>>, %arg5: memref<16x384xf32, #tpu.memory_space<vmem>>) attributes {dimension_semantics = [#tpu.dimension_semantics<parallel>], iteration_bounds = array<i64: 1>, scalar_prefetch = 0 : i64, scratch_operands = 1 : i64, tpu.core_type = #tpu.core_type<tc>, window_params = [{transform_indices = @transform_0, window_bounds = array<i64: 1, 16, 128>}, {pipeline_mode = #tpu.pipeline_mode<synchronous>, transform_indices = @transform_1, window_bounds = array<i64: 384, 128>}, {pipeline_mode = #tpu.pipeline_mode<synchronous>, transform_indices = @transform_2, window_bounds = array<i64: 1, 128>}, {transform_indices = @transform_3, window_bounds = array<i64: 1, 16, 128>}]} {
    %cst = arith.constant 0.000000e+00 : f32
    %0 = vector.broadcast %cst : f32 to vector<1x128xf32>
    %c0 = arith.constant 0 : index
    %c0_0 = arith.constant 0 : index
    %c0_1 = arith.constant 0 : index
    %1 = vector.load %arg1[%c0, %c0_0, %c0_1] : memref<1x16x128xf32, #tpu.memory_space<vmem>>, vector<1x16x128xf32>
    %2 = vector.shape_cast %1 : vector<1x16x128xf32> to vector<16x128xf32>
    %c0_2 = arith.constant 0 : index
    %c0_3 = arith.constant 0 : index
    %3 = vector.load %arg5[%c0_2, %c0_3] : memref<16x384xf32, #tpu.memory_space<vmem>>, vector<1x128xf32>
    tpu.vector_store %arg5[%c0_2, %c0_3], %0 {strides = array<i32>} : memref<16x384xf32, #tpu.memory_space<vmem>>, vector<1x128xf32>,
    %4 = vector.extract_strided_slice %2 {offsets = [0, 0], sizes = [15, 128], strides = [1, 1]} : vector<16x128xf32> to vector<15x128xf32>
    %c1 = arith.constant 1 : index
    %c0_4 = arith.constant 0 : index
    %5 = vector.load %arg5[%c1, %c0_4] : memref<16x384xf32, #tpu.memory_space<vmem>>, vector<15x128xf32>
    tpu.vector_store %arg5[%c1, %c0_4], %4 {strides = array<i32>} : memref<16x384xf32, #tpu.memory_space<vmem>>, vector<15x128xf32>,
    %c0_5 = arith.constant 0 : index
    %c128 = arith.constant 128 : index
    %6 = vector.load %arg5[%c0_5, %c128] : memref<16x384xf32, #tpu.memory_space<vmem>>, vector<16x128xf32>
    tpu.vector_store %arg5[%c0_5, %c128], %2 {strides = array<i32>} : memref<16x384xf32, #tpu.memory_space<vmem>>, vector<16x128xf32>,
    %7 = vector.extract_strided_slice %2 {offsets = [1, 0], sizes = [15, 128], strides = [1, 1]} : vector<16x128xf32> to vector<15x128xf32>
    %c0_6 = arith.constant 0 : index
    %c256 = arith.constant 256 : index
    %8 = vector.load %arg5[%c0_6, %c256] : memref<16x384xf32, #tpu.memory_space<vmem>>, vector<15x128xf32>
    tpu.vector_store %arg5[%c0_6, %c256], %7 {strides = array<i32>} : memref<16x384xf32, #tpu.memory_space<vmem>>, vector<15x128xf32>,
    %c15 = arith.constant 15 : index
    %c256_7 = arith.constant 256 : index
    %9 = vector.load %arg5[%c15, %c256_7] : memref<16x384xf32, #tpu.memory_space<vmem>>, vector<1x128xf32>
    tpu.vector_store %arg5[%c15, %c256_7], %0 {strides = array<i32>} : memref<16x384xf32, #tpu.memory_space<vmem>>, vector<1x128xf32>,
    %c0_8 = arith.constant 0 : index
    %c0_9 = arith.constant 0 : index
    %10 = vector.load %arg5[%c0_8, %c0_9] : memref<16x384xf32, #tpu.memory_space<vmem>>, vector<16x384xf32>
    %c0_10 = arith.constant 0 : index
    %c0_11 = arith.constant 0 : index
    %11 = vector.load %arg2[%c0_10, %c0_11] : memref<384x128xf32, #tpu.memory_space<vmem>>, vector<384x128xf32>
    %cst_12 = arith.constant dense<0.000000e+00> : vector<16x128xf32>
    %12 = tpu.matmul %10, %11, %cst_12 {dimension_numbers = #tpu.dot_dimension_numbers<[1], [0], [0], [1], [0, 0, 1, 1], [], []>} : vector<16x384xf32>, vector<384x128xf32>, vector<16x128xf32> -> vector<16x128xf32>
    %c0_13 = arith.constant 0 : index
    %c0_14 = arith.constant 0 : index
    %13 = vector.load %arg3[%c0_13, %c0_14] : memref<1x128xf32, #tpu.memory_space<vmem>>, vector<1x128xf32>
    %14 = vector.broadcast %13 : vector<1x128xf32> to vector<16x128xf32>
    %15 = arith.addf %12, %14 : vector<16x128xf32>
    %16 = math.tanh %15 : vector<16x128xf32>
    %c0_15 = arith.constant 0 : index
    %c0_16 = arith.constant 0 : index
    %c0_17 = arith.constant 0 : index
    %17 = vector.load %arg1[%c0_15, %c0_16, %c0_17] : memref<1x16x128xf32, #tpu.memory_space<vmem>>, vector<1x16x128xf32>
    %18 = vector.shape_cast %17 : vector<1x16x128xf32> to vector<16x128xf32>
    %19 = arith.addf %18, %16 : vector<16x128xf32>
    %20 = vector.shape_cast %19 : vector<16x128xf32> to vector<1x16x128xf32>
    %c0_18 = arith.constant 0 : index
    %c0_19 = arith.constant 0 : index
    %c0_20 = arith.constant 0 : index
    %21 = vector.load %arg4[%c0_18, %c0_19, %c0_20] : memref<1x16x128xf32, #tpu.memory_space<vmem>>, vector<1x16x128xf32>
    tpu.vector_store %arg4[%c0_18, %c0_19, %c0_20], %20 {strides = array<i32>} : memref<1x16x128xf32, #tpu.memory_space<vmem>>, vector<1x16x128xf32>,
    return
  }
  func.func @transform_0(%arg0: i32) -> (i32, i32, i32) {
    %c0_i32 = arith.constant 0 : i32
    %c0_i32_0 = arith.constant 0 : i32
    %c0_i32_1 = arith.constant 0 : i32
    return %arg0, %c0_i32, %c0_i32_0 : i32, i32, i32
  }
  func.func @transform_1(%arg0: i32) -> (i32, i32) {
    %c0_i32 = arith.constant 0 : i32
    %c0_i32_0 = arith.constant 0 : i32
    %c0_i32_1 = arith.constant 0 : i32
    return %c0_i32, %c0_i32_0 : i32, i32
  }
  func.func @transform_2(%arg0: i32) -> (i32, i32) {
    %c0_i32 = arith.constant 0 : i32
    %c0_i32_0 = arith.constant 0 : i32
    %c0_i32_1 = arith.constant 0 : i32
    return %c0_i32, %c0_i32_0 : i32, i32
  }
  func.func @transform_3(%arg0: i32) -> (i32, i32, i32) {
    %c0_i32 = arith.constant 0 : i32
    %c0_i32_0 = arith.constant 0 : i32
    %c0_i32_1 = arith.constant 0 : i32
    return %arg0, %c0_i32, %c0_i32_0 : i32, i32, i32
  }
}

</mosaic_0001>

<bundles_post_ra>
// kernel: tpu_custom_call.1
= control target key start
LH: loop header
LB: loop body
LE: loop exit
PB: predicated region body
PF: predicated region fallthrough
CT: control target
= control target key end

     0   :  { %8 = vsyncpa [#allocation4], 0  ;;  %s392_s0 = inlined_call_operand.hbm [shape: f32[1,16,128], index: 0, kind: input, shape index: {}]   ;;  %s393_s1 = inlined_call_operand.hbm [shape: f32[384,128], index: 1, kind: input, shape index: {}]   ;;  %s394_s2 = inlined_call_operand.vmem [shape: f32[1,128], index: 2, kind: input, shape index: {}]   ;;  %s395_s3 = inlined_call_operand.hbm [shape: f32[1,16,128], index: 3, kind: output, shape index: {}]  }
   0x1   :  { %9 = vsyncpa [#allocation7], 0 }
   0x2   :  { %10 = vsyncpa [#allocation5], 0  ;;  %s15_s14 = sshll.u32 %s392_s0, 4  ;;  %s331_s15 = smov [#allocation3]   ;;  %s16_s14 = int_to_ptr.hbm [resolvable:$true] %s15_s14 }
   0x3   :  { %s17_s16 = sshll.u32 %s331_s15, 4  ;;  %s28_s19 = sshll.u32 %s393_s1, 4  ;;  %s18_s16 = int_to_ptr.vmem [resolvable:$true] %s17_s16  ;;  %s29_s19 = int_to_ptr.hbm [resolvable:$true] %s28_s19 }
   0x4   :  { %s332_s20 = smov 128   ;;  %s333_s21 = smov 8  }
   0x5   :  { %23 = dma.hbm_to_vmem [thread:$0]  %s16_s14, 256, %s18_s16, [#allocation4], %s332_s20, %s332_s20, %s333_s21  }
   0x6   :  { %s334_s22 = smov [#allocation6]  }
   0x7   :  { %s30_s23 = sshll.u32 %s334_s22, 4  ;;  %s31_s23 = int_to_ptr.vmem [resolvable:$true] %s30_s23 }
   0x8   :  { %36 = dma.hbm_to_vmem [thread:$0]  %s29_s19, 6144, %s31_s23, [#allocation7], %s332_s20, %s332_s20, %s333_s21  }
   0x9   :  { %325 = dma.done.wait [#allocation4], 256  }
   0xa   :  { %326 = vsyncadd [#allocation4], 4294967040 }
   0xb   :  { %327 = dma.done.wait [#allocation7], 6144  }
   0xc   :  { %328 = vsyncadd [#allocation7], 4294961152  ;;  %v335_v0 = vmov 0.0   ;;  %v124_v1 = vld [vmem:[#allocation6 + $0x178] sm:$0xff]  ;;  %v123_v3 = vld [vmem:[#allocation6 + $0x170] sm:$0xff]  ;;  %vm62_vm0 = vcmask 1046528  }
   0xd   :  { %49 = vst [vmem:[#allocation2] sm:$0x1] %v335_v0  ;;  %v92_v2 = vld [vmem:[#allocation6 + $0x78] sm:$0xff]  ;;  %175 = vmatpush.msra.mxu2 %v124_v1  ;;  %v91_v4 = vld [vmem:[#allocation6 + $0x70] sm:$0xff]  ;;  %v122_v6 = vld [vmem:[#allocation6 + $0x168] sm:$0xff]  ;;  %vm52_vm1 = vcmask 1040384  }
   0xe   :  { %70 = vst [vmem:[#allocation2 + $0x2f] sm:$0x1] %v335_v0  ;;  %129 = vmatpush.msra.mxu0 %v92_v2  ;;  %v108_v5 = vld [vmem:[#allocation6 + $0xf8] sm:$0xff]  ;;  %226 = vmatpush.msra.mxu3 %v92_v2  ;;  %v90_v7 = vld [vmem:[#allocation6 + $0x68] sm:$0xff]  ;;  %v107_v8 = vld [vmem:[#allocation6 + $0xf0] sm:$0xff]  ;;  %s336_s24 = smov [#allocation8]  }
   0xf   :  { %152 = vmatpush.msra.mxu1 %v108_v5  ;;  %176 = vmatpush.msra.mxu2 %v123_v3  ;;  %v106_v9 = vld [vmem:[#allocation6 + $0xe8] sm:$0xff]  ;;  %v121_v10 = vld [vmem:[#allocation6 + $0x160] sm:$0xff]  ;;  %v120_v13 = vld [vmem:[#allocation6 + $0x158] sm:$0xff]  ;;  %s212_s27 = sshll.u32 %s395_s3, 4  ;;  %s213_s27 = int_to_ptr.hbm [resolvable:$true] %s212_s27 }
  0x10   :  { %130 = vmatpush.msra.mxu0 %v91_v4  ;;  %227 = vmatpush.msra.mxu3 %v91_v4  ;;  %v89_v11 = vld [vmem:[#allocation6 + $0x60] sm:$0xff]  ;;  %v88_v14 = vld [vmem:[#allocation6 + $0x58] sm:$0xff]  ;;  %v119_v16 = vld [vmem:[#allocation6 + $0x150] sm:$0xff] }
  0x11   :  { %153 = vmatpush.msra.mxu1 %v107_v8  ;;  %177 = vmatpush.msra.mxu2 %v122_v6  ;;  %v105_v12 = vld [vmem:[#allocation6 + $0xe0] sm:$0xff]  ;;  %v104_v15 = vld [vmem:[#allocation6 + $0xd8] sm:$0xff]  ;;  %v87_v17 = vld [vmem:[#allocation6 + $0x50] sm:$0xff] }
  0x12   :  { %131 = vmatpush.msra.mxu0 %v90_v7  ;;  %228 = vmatpush.msra.mxu3 %v90_v7  ;;  %v103_v18 = vld [vmem:[#allocation6 + $0xd0] sm:$0xff]  ;;  %v118_v19 = vld [vmem:[#allocation6 + $0x148] sm:$0xff]  ;;  %v117_v22 = vld [vmem:[#allocation6 + $0x140] sm:$0xff] }
  0x13   :  { %154 = vmatpush.msra.mxu1 %v106_v9  ;;  %178 = vmatpush.msra.mxu2 %v121_v10  ;;  %v86_v20 = vld [vmem:[#allocation6 + $0x48] sm:$0xff]  ;;  %v85_v23 = vld [vmem:[#allocation6 + $0x40] sm:$0xff]  ;;  %v116_v25 = vld [vmem:[#allocation6 + $0x138] sm:$0xff] }
  0x14   :  { %132 = vmatpush.msra.mxu0 %v89_v11  ;;  %229 = vmatpush.msra.mxu3 %v89_v11  ;;  %v102_v21 = vld [vmem:[#allocation6 + $0xc8] sm:$0xff]  ;;  %v101_v24 = vld [vmem:[#allocation6 + $0xc0] sm:$0xff]  ;;  %v84_v26 = vld [vmem:[#allocation6 + $0x38] sm:$0xff] }
  0x15   :  { %155 = vmatpush.msra.mxu1 %v105_v12  ;;  %179 = vmatpush.msra.mxu2 %v120_v13  ;;  %v100_v27 = vld [vmem:[#allocation6 + $0xb8] sm:$0xff]  ;;  %v369_v28 = vld [vmem:[#allocation3] sm:$0xff]  ;;  %v114_v37 = vld [vmem:[#allocation6 + $0x128] sm:$0xff] }
  0x16   :  { %133 = vmatpush.msra.mxu0 %v88_v14  ;;  %230 = vmatpush.msra.mxu3 %v88_v14  ;;  %v371_v29 = vld [vmem:[#allocation3 + $0x8] sm:$0xff]  ;;  %v115_v30 = vld [vmem:[#allocation6 + $0x130] sm:$0xff]  ;;  %v63_v32 = vrot.slane %v369_v28, 1  ;;  %v53_v34 = vrot.slane %v369_v28, 7  ;;  %v82_v38 = vld [vmem:[#allocation6 + $0x28] sm:$0xff] }
  0x17   :  { %156 = vmatpush.msra.mxu1 %v104_v15  ;;  %180 = vmatpush.msra.mxu2 %v119_v16  ;;  %v83_v31 = vld [vmem:[#allocation6 + $0x30] sm:$0xff]  ;;  %v64_v33 = vrot.slane %v371_v29, 1  ;;  %v54_v36 = vrot.slane %v371_v29, 7  ;;  %v98_v40 = vld [vmem:[#allocation6 + $0xa8] sm:$0xff]  ;;  %v113_v41 = vld [vmem:[#allocation6 + $0x120] sm:$0xff] }
  0x18   :  { %134 = vmatpush.msra.mxu0 %v87_v17  ;;  %231 = vmatpush.msra.mxu3 %v87_v17  ;;  %v99_v35 = vld [vmem:[#allocation6 + $0xb0] sm:$0xff]  ;;  %v81_v42 = vld [vmem:[#allocation6 + $0x20] sm:$0xff]  ;;  %58 = vst [vmem:[#allocation2] sm:$0xfe] %v53_v34  ;;  %v112_v45 = vld [vmem:[#allocation6 + $0x118] sm:$0xff] }
  0x19   :  { %157 = vmatpush.msra.mxu1 %v103_v18  ;;  %181 = vmatpush.msra.mxu2 %v118_v19  ;;  %v65_v39 = vsel %vm62_vm0, %v63_v32, %v64_v33  ;;  %69 = vst [vmem:[#allocation2 + $0x28] sm:$0x7f] %v64_v33  ;;  %v55_v43 = vsel %vm52_vm1, %v53_v34, %v54_v36  ;;  %v97_v44 = vld [vmem:[#allocation6 + $0xa0] sm:$0xff]  ;;  %v80_v46 = vld [vmem:[#allocation6 + $0x18] sm:$0xff]  ;;  %v111_v48 = vld [vmem:[#allocation6 + $0x110] sm:$0xff] }
  0x1a   :  { %135 = vmatpush.msra.mxu0 %v86_v20  ;;  %232 = vmatpush.msra.mxu3 %v86_v20  ;;  %v96_v47 = vld [vmem:[#allocation6 + $0x98] sm:$0xff]  ;;  %v79_v49 = vld [vmem:[#allocation6 + $0x10] sm:$0xff]  ;;  %v110_v51 = vld [vmem:[#allocation6 + $0x108] sm:$0xff] }
  0x1b   :  { %158 = vmatpush.msra.mxu1 %v102_v21  ;;  %182 = vmatpush.msra.mxu2 %v117_v22  ;;  %v95_v50 = vld [vmem:[#allocation6 + $0x90] sm:$0xff]  ;;  %v78_v52 = vld [vmem:[#allocation6 + $0x8] sm:$0xff]  ;;  %v109_v54 = vld [vmem:[#allocation6 + $0x100] sm:$0xff] }
  0x1c   :  { %136 = vmatpush.msra.mxu0 %v85_v23  ;;  %233 = vmatpush.msra.mxu3 %v85_v23  ;;  %v94_v53 = vld [vmem:[#allocation6 + $0x88] sm:$0xff]  ;;  %v77_v55 = vld [vmem:[#allocation6] sm:$0xff] }
  0x1d   :  { %159 = vmatpush.msra.mxu1 %v101_v24  ;;  %183 = vmatpush.msra.mxu2 %v116_v25  ;;  %v93_v57 = vld [vmem:[#allocation6 + $0x80] sm:$0xff] }
  0x1e   :  { %137 = vmatpush.msra.mxu0 %v84_v26  ;;  %234 = vmatpush.msra.mxu3 %v84_v26  ;;  %v248_v59 = vld [vmem:[%s394_s2] ss:$0 sm:$0xff]  ;;  %s210_s2 = sshll.u32 %s336_s24, 4  ;;  %s211_s2 = int_to_ptr.vmem [resolvable:$true] %s210_s2 }
  0x1f   :  { %160 = vmatpush.msra.mxu1 %v100_v27  ;;  %184 = vmatpush.msra.mxu2 %v115_v30  ;;  %v71_v56 = vld [vmem:[#allocation2] sm:$0xff] }
  0x20   :  { %138 = vmatpush.msra.mxu0 %v83_v31  ;;  %235 = vmatpush.msra.mxu3 %v83_v31  ;;  %v76_v58 = vld [vmem:[#allocation2 + $0x28] sm:$0xff] }
  0x21   :  { %161 = vmatpush.msra.mxu1 %v99_v35  ;;  %185 = vmatpush.msra.mxu2 %v114_v37 }
  0x22   :  { %139 = vmatpush.msra.mxu0 %v82_v38  ;;  %236 = vmatpush.msra.mxu3 %v82_v38 }
  0x23   :  { %162 = vmatpush.msra.mxu1 %v98_v40  ;;  %186 = vmatpush.msra.mxu2 %v113_v41 }
  0x24   :  { %140 = vmatpush.msra.mxu0 %v81_v42  ;;  %237 = vmatpush.msra.mxu3 %v81_v42 }
  0x25   :  { %163 = vmatpush.msra.mxu1 %v97_v44  ;;  %187 = vmatpush.msra.mxu2 %v112_v45 }
  0x26   :  { %141 = vmatpush.msra.mxu0 %v80_v46  ;;  %238 = vmatpush.msra.mxu3 %v80_v46 }
  0x27   :  { %164 = vmatpush.msra.mxu1 %v96_v47  ;;  %188 = vmatpush.msra.mxu2 %v111_v48 }
  0x28   :  { %142 = vmatpush.msra.mxu0 %v79_v49  ;;  %239 = vmatpush.msra.mxu3 %v79_v49 }
  0x29   :  { %165 = vmatpush.msra.mxu1 %v95_v50  ;;  %189 = vmatpush.msra.mxu2 %v110_v51 }
  0x2a   :  { %143 = vmatpush.msra.mxu0 %v78_v52  ;;  %240 = vmatpush.msra.mxu3 %v78_v52 }
  0x2b   :  { %166 = vmatpush.msra.mxu1 %v94_v53  ;;  %190 = vmatpush.msra.mxu2 %v109_v54 }
  0x2c   :  { %144 = vmatpush.msra.mxu0 %v77_v55  ;;  %191 = vmatmul.f32.vlgmr.msra.gmra.mxu2 %v65_v39 }
  0x2d   :  { %145 = vmatmul.f32.vlgmr.msra.gmra.mxu0 %v71_v56  ;;  %241 = vmatpush.msra.mxu3 %v77_v55 }
  0x2e   :  { %167 = vmatpush.msra.mxu1 %v93_v57  ;;  %148 = vmatmul.f32.vlgmr.msra.gmra.mxu3 %v55_v43 }
  0x2f   :  { %168 = vmatmul.f32.vlgmr.msra.gmra.mxu1 %v369_v28 }
  0x34   :  { %194 = vmatmul.f32.gmra.mxu2 %v76_v58 }
  0x37   :  { %171 = vmatmul.f32.gmra.mxu1 %v371_v29 }
  0xaa   :  { %v146_v60 = vpop.f32.mrf.mxu0 }
  0xab   :  { %v147_v61 = vadd.f32 %v248_v59, %v146_v60 }
  0xac   :  { %v169_v62 = vpop.f32.mrf.mxu1 }
  0xad   :  { %v170_v63 = vadd.f32 %v169_v62, %v147_v61 }
  0xaf   :  { %v192_v0 = vpop.f32.mrf.mxu2 }
  0xb0   :  { %v193_v1 = vadd.f32 %v192_v0, %v170_v63 }
  0xb1   :  { %v149_v2 = vpop.f32.mrf.mxu3 }
  0xb2   :  { %249 = vtanh.f32 %v193_v1  ;;  %v150_v3 = vadd.f32 %v248_v59, %v149_v2 }
  0xb4   :  { %v172_v4 = vpop.f32.mrf.mxu1 }
  0xb5   :  { %v173_v5 = vadd.f32 %v172_v4, %v150_v3 }
  0xb7   :  { %v195_v6 = vpop.f32.mrf.mxu2 }
  0xb8   :  { %v250_v7 = vpop.eup %249  ;;  %v196_v8 = vadd.f32 %v195_v6, %v173_v5 }
  0xb9   :  { %v202_v9 = vadd.f32 %v250_v7, %v369_v28 }
  0xba   :  { %251 = vtanh.f32 %v196_v8 }
  0xbb   :  { %204 = vst [vmem:[#allocation8] sm:$0xff] %v202_v9 }
  0xc0   :  { %v252_v10 = vpop.eup %251 }
  0xc1   :  { %v203_v11 = vadd.f32 %v252_v10, %v371_v29 }
  0xc3   :  { %205 = vst [vmem:[#allocation8 + $0x8] sm:$0xff] %v203_v11 }
  0xc4   :  { %218 = dma.vmem_to_hbm [thread:$0]  %s211_s2, 256, %s213_s27, [#allocation5], %s332_s20, %s332_s20, %s333_s21  }
  0xc5   :  { %329 = dma.done.wait [#allocation5], 256  }
  0xc6   :  { %330 = vsyncadd [#allocation5], 4294967040 }
  0xc7   :  { %223 = vsyncpa [#allocation4], 1 }
  0xc8   :  { %224 = vsyncpa [#allocation7], 1 }
  0xc9   :  { %225 = vsyncpa [#allocation5], 1 }

</bundles_post_ra>
